<compile_context>
chip_gen: v5e
topology: v5e:2x2
jax: 0.10.0
libtpu: 0.0.40
codegen_flags: <defaults>
</compile_context>

<pallas_src>
import math

import jax
import jax.numpy as jnp
from jax.experimental import pallas as pl
from jax.experimental.pallas import tpu as pltpu


def _make_kernel(W, Cin, K, res_scales, dilations):
    """Fused MultiResBlock body. Refs: x, Wb, bshift, Wr, rshift, out."""

    def kernel(x_ref, wb_ref, bshift_ref, wr_ref, rshift_ref, o_ref):
        x = x_ref[...]                                   # [Cin, T] f32
        T = x.shape[1]

        # Lane position within its spatial row.  Block starts are multiples
        # of W (T % W == 0), so the local index mod W equals the global one.
        w_pos = jax.lax.broadcasted_iota(jnp.int32, (1, T), 1) % W

        # im2col slab: lane-shifted (dilated) copies of x, zeroed outside the
        # originating row (replaces per-row zero padding).
        taps = []
        for s in range(res_scales):
            d = dilations[s]
            for k in range(K):
                off = (k - K // 2) * d
                if off == 0:
                    taps.append(x)
                else:
                    rolled = pltpu.roll(x, shift=(-off) % T, axis=1)
                    valid = jnp.logical_and(w_pos + off >= 0, w_pos + off < W)
                    taps.append(jnp.where(valid, rolled, 0.0))
        slab = jnp.concatenate(taps, axis=0)             # [res_scales*K*Cin, T]

        # All branch convs (BN scale folded into wb) as a single MXU matmul,
        # then shift + ReLU.
        feat = jnp.maximum(
            jnp.dot(wb_ref[...], slab, preferred_element_type=jnp.float32)
            + bshift_ref[...], 0.0)                      # [res_scales*Cres, T]

        # 1x1 reduction conv over [identity, branch feats] as one matmul.
        cat = jnp.concatenate([x, feat], axis=0)         # [Ctot, T]
        out = jnp.maximum(
            jnp.dot(wr_ref[...], cat, preferred_element_type=jnp.float32)
            + rshift_ref[...], 0.0)                      # [Cout, T]
        o_ref[...] = out.astype(o_ref.dtype)

    return kernel


def multires_block_pallas(x, params, *, base_kernel_size=3, res_scales=2,
                          eps=1e-5, block_target_bytes=2 << 20):
    """x: [B, Cin, H, W] (NCHW, float32). Returns [B, Cout, H, W]."""
    B, Cin, H, W = x.shape
    K = base_kernel_size + 1 - base_kernel_size % 2          # odd kernel width
    dilations = [2 ** i for i in range(res_scales)]
    Cres = params["res_w"][0].shape[2]
    Cout = params["red_w"].shape[1]
    Ctot = Cin + res_scales * Cres
    KC = K * Cin
    n_bfeat = res_scales * Cres

    # ---- Constant-fold BatchNorm (eval) into the conv weights (wrapper). ----
    def fold(bn):
        gamma, beta, mean, var = bn
        scale = gamma * jax.lax.rsqrt(var + eps)
        return scale, beta - mean * scale

    wb = jnp.zeros((n_bfeat, res_scales * KC), jnp.float32)  # block-diagonal
    bshift = []
    for s in range(res_scales):
        scale, shift = fold(params["res_bn"][s])
        wf = params["res_w"][s] * scale[None, None, :]        # [K, Cin, Cres]
        wf = jnp.transpose(wf, (2, 0, 1)).reshape(Cres, KC)   # [Cres, K*Cin]
        wb = wb.at[s * Cres:(s + 1) * Cres, s * KC:(s + 1) * KC].set(wf)
        bshift.append(shift)
    bshift = jnp.concatenate(bshift)[:, None]                 # [n_bfeat, 1]

    rscale, rshift = fold(params["red_bn"])
    wr = (params["red_w"] * rscale[None, :]).T                # [Cout, Ctot]
    rshift = rshift[:, None]                                  # [Cout, 1]

    # ---- Channel-first, flattened-spatial (lane-dense) layout. ----
    S = B * H * W
    x_cs = jnp.transpose(x, (1, 0, 2, 3)).reshape(Cin, S)

    # Lane-block size: multiple of 128 (lane width) and of W (rows must not
    # straddle block boundaries); sized to ~block_target_bytes of live
    # activations, keeping >= 2 grid steps when possible (megacore / v7x).
    L = 128 * W // math.gcd(128, W)
    per_col = 4 * (2 * (Cin + Cout) + res_scales * KC + n_bfeat + Ctot)
    T = max(L, (block_target_bytes // per_col) // L * L)
    T = min(T, max(L, (S // 2) // L * L))
    Sp = pl.cdiv(S, T) * T
    if Sp != S:
        x_cs = jnp.pad(x_cs, ((0, 0), (0, Sp - S)))
    grid = (Sp // T,)

    kernel = _make_kernel(W, Cin, K, res_scales, dilations)

    out = pl.pallas_call(
        kernel,
        out_shape=jax.ShapeDtypeStruct((Cout, Sp), x.dtype),
        grid=grid,
        in_specs=[
            pl.BlockSpec((Cin, T), lambda i: (0, i)),
            pl.BlockSpec((n_bfeat, res_scales * KC), lambda i: (0, 0)),
            pl.BlockSpec((n_bfeat, 1), lambda i: (0, 0)),
            pl.BlockSpec((Cout, Ctot), lambda i: (0, 0)),
            pl.BlockSpec((Cout, 1), lambda i: (0, 0)),
        ],
        out_specs=pl.BlockSpec((Cout, T), lambda i: (0, i)),
        compiler_params=pltpu.CompilerParams(
            dimension_semantics=("parallel",),
            vmem_limit_bytes=32 * 1024 * 1024,
        ),
    )(x_cs, wb, bshift, wr, rshift)

    out = out[:, :S].reshape(Cout, B, H, W)
    return jnp.transpose(out, (1, 0, 2, 3))


def multires_block_ref(x, params, *, base_kernel_size=3, res_scales=2,
                       eps=1e-5):
    """Pure-JAX reference with identical math (correctness check)."""
    B, Cin, H, W = x.shape
    K = base_kernel_size + 1 - base_kernel_size % 2
    dilations = [2 ** i for i in range(res_scales)]
    P = max((base_kernel_size // 2) * d for d in dilations)

    x_rows = jnp.transpose(x, (0, 2, 3, 1)).reshape(B * H, W, Cin)
    x_pad = jnp.pad(x_rows, ((0, 0), (P, P), (0, 0)))

    feats = [x_rows]
    for s in range(res_scales):
        d = dilations[s]
        w = params["res_w"][s]
        gamma, beta, mean, var = params["res_bn"][s]
        scale = gamma / jnp.sqrt(var + eps)
        shift = beta - mean * scale
        acc = jnp.zeros((B * H, W, w.shape[2]), jnp.float32)
        for k in range(K):
            off = P + (k - K // 2) * d
            acc = acc + jnp.einsum("nwc,cd->nwd", x_pad[:, off:off + W, :],
                                   w[k])
        feats.append(jnp.maximum(acc * scale + shift, 0.0))
    cat = jnp.concatenate(feats, axis=-1)

    gamma_r, beta_r, mean_r, var_r = params["red_bn"]
    rscale = gamma_r / jnp.sqrt(var_r + eps)
    rshift = beta_r - mean_r * rscale
    red = jnp.einsum("nwc,co->nwo", cat, params["red_w"])
    out = jnp.maximum(red * rscale + rshift, 0.0)
    Cout = params["red_w"].shape[1]
    return jnp.transpose(out.reshape(B, H, W, Cout), (0, 3, 1, 2))


def init_params(key, Cin, Cres, Cout, base_kernel_size, res_scales):
    K = base_kernel_size + 1 - base_kernel_size % 2
    keys = jax.random.split(key, res_scales + 1)
    params = {"res_w": [], "res_bn": []}
    for s in range(res_scales):
        w = jax.random.normal(keys[s], (K, Cin, Cres), jnp.float32) * 0.1
        gamma = 1.0 + 0.05 * jnp.arange(Cres, dtype=jnp.float32)
        beta = 0.01 * jnp.arange(Cres, dtype=jnp.float32) - 0.02
        mean = 0.03 * jnp.arange(Cres, dtype=jnp.float32) - 0.05
        var = 1.0 + 0.1 * jnp.arange(Cres, dtype=jnp.float32)
        params["res_w"].append(w)
        params["res_bn"].append((gamma, beta, mean, var))
    Ctot = Cin + res_scales * Cres
    wr = jax.random.normal(keys[-1], (Ctot, Cout), jnp.float32) * 0.1
    gamma_r = 1.0 + 0.03 * jnp.arange(Cout, dtype=jnp.float32)
    beta_r = 0.02 * jnp.arange(Cout, dtype=jnp.float32) - 0.05
    mean_r = 0.01 * jnp.arange(Cout, dtype=jnp.float32)
    var_r = 1.0 + 0.05 * jnp.arange(Cout, dtype=jnp.float32)
    params["red_w"] = wr
    params["red_bn"] = (gamma_r, beta_r, mean_r, var_r)
    return params


if __name__ == "__main__":
    # MultiResBlock(in_channels=4, out_channels=8, res_channels=4,
    #               base_kernel_size=3, stride=1, res_scales=2,
    #               dilation=True, use_inputs=True)
    B, Cin, H, W = 2, 4, 16, 16
    Cres, Cout = 4, 8
    base_kernel_size, res_scales = 3, 2

    key = jax.random.PRNGKey(0)
    kx, kp = jax.random.split(key)
    x = jax.random.normal(kx, (B, Cin, H, W), jnp.float32)
    params = init_params(kp, Cin, Cres, Cout, base_kernel_size, res_scales)

    out = multires_block_pallas(x, params,
                                base_kernel_size=base_kernel_size,
                                res_scales=res_scales)
    out = jax.block_until_ready(out)

    ref = multires_block_ref(x, params,
                             base_kernel_size=base_kernel_size,
                             res_scales=res_scales)
    assert out.shape == (B, Cout, H, W)
    err = float(jnp.max(jnp.abs(out - ref)))
    assert jnp.allclose(out, ref, atol=1e-4, rtol=1e-4), err
    print("KERNEL_OK")
</pallas_src>

<mosaic_0001>
module attributes {stable_mosaic.version = 11 : i64} {
  func.func @kernel(%arg0: i32, %arg1: memref<4x256xf32, #tpu.memory_space<vmem>>, %arg2: memref<8x24xf32, #tpu.memory_space<vmem>>, %arg3: memref<8x1xf32, #tpu.memory_space<vmem>>, %arg4: memref<8x12xf32, #tpu.memory_space<vmem>>, %arg5: memref<8x1xf32, #tpu.memory_space<vmem>>, %arg6: memref<8x256xf32, #tpu.memory_space<vmem>>) attributes {dimension_semantics = [#tpu.dimension_semantics<parallel>], iteration_bounds = array<i64: 2>, scalar_prefetch = 0 : i64, scratch_operands = 0 : i64, tpu.core_type = #tpu.core_type<tc>, window_params = [{transform_indices = @transform_0, window_bounds = array<i64: 4, 256>}, {pipeline_mode = #tpu.pipeline_mode<synchronous>, transform_indices = @transform_1, window_bounds = array<i64: 8, 24>}, {pipeline_mode = #tpu.pipeline_mode<synchronous>, transform_indices = @transform_2, window_bounds = array<i64: 8, 1>}, {pipeline_mode = #tpu.pipeline_mode<synchronous>, transform_indices = @transform_3, window_bounds = array<i64: 8, 12>}, {pipeline_mode = #tpu.pipeline_mode<synchronous>, transform_indices = @transform_4, window_bounds = array<i64: 8, 1>}, {transform_indices = @transform_5, window_bounds = array<i64: 8, 256>}]} {
    %c0 = arith.constant 0 : index
    %c0_0 = arith.constant 0 : index
    %0 = vector.load %arg1[%c0, %c0_0] : memref<4x256xf32, #tpu.memory_space<vmem>>, vector<4x256xf32>
    %1 = tpu.iota {dimensions = array<i32: 1>} : vector<1x256xi32>
    %c16_i32 = arith.constant 16 : i32
    %c0_i32 = arith.constant 0 : i32
    %2 = arith.cmpi eq, %c16_i32, %c0_i32 : i32
    %c1_i32 = arith.constant 1 : i32
    %3 = arith.select %2, %c1_i32, %c16_i32 : i32
    %4 = vector.broadcast %3 : i32 to vector<1x256xi32>
    %5 = arith.remsi %1, %4 : vector<1x256xi32>
    %c0_i32_1 = arith.constant 0 : i32
    %6 = vector.broadcast %c0_i32_1 : i32 to vector<1x256xi32>
    %7 = arith.cmpi ne, %5, %6 : vector<1x256xi32>
    %c0_i32_2 = arith.constant 0 : i32
    %8 = vector.broadcast %c0_i32_2 : i32 to vector<1x256xi32>
    %9 = arith.cmpi slt, %5, %8 : vector<1x256xi32>
    %c0_i32_3 = arith.constant 0 : i32
    %10 = arith.cmpi slt, %3, %c0_i32_3 : i32
    %11 = vector.broadcast %10 : i1 to vector<1x256xi1>
    %12 = vector.broadcast %11 : vector<1x256xi1> to vector<1x256xi1>
    %13 = arith.xori %9, %12 : vector<1x256xi1>
    %14 = arith.andi %13, %7 : vector<1x256xi1>
    %15 = vector.broadcast %3 : i32 to vector<1x256xi32>
    %16 = arith.addi %5, %15 : vector<1x256xi32>
    %17 = arith.select %14, %16, %5 : vector<1x256xi1>, vector<1x256xi32>
    %c1_i32_4 = arith.constant 1 : i32
    %18 = tpu.dynamic_rotate %0 by %c1_i32_4 dim 1 : vector<4x256xf32>, i32 -> vector<4x256xf32>
    %c-1_i32 = arith.constant -1 : i32
    %19 = vector.broadcast %c-1_i32 : i32 to vector<1x256xi32>
    %20 = arith.addi %17, %19 : vector<1x256xi32>
    %c0_i32_5 = arith.constant 0 : i32
    %21 = vector.broadcast %c0_i32_5 : i32 to vector<1x256xi32>
    %22 = arith.cmpi sge, %20, %21 : vector<1x256xi32>
    %c-1_i32_6 = arith.constant -1 : i32
    %23 = vector.broadcast %c-1_i32_6 : i32 to vector<1x256xi32>
    %24 = arith.addi %17, %23 : vector<1x256xi32>
    %c16_i32_7 = arith.constant 16 : i32
    %25 = vector.broadcast %c16_i32_7 : i32 to vector<1x256xi32>
    %26 = arith.cmpi slt, %24, %25 : vector<1x256xi32>
    %27 = arith.andi %22, %26 : vector<1x256xi1>
    %cst = arith.constant 0.000000e+00 : f32
    %28 = vector.shape_cast %27 : vector<1x256xi1> to vector<1x256xi1>
    %29 = vector.broadcast %28 : vector<1x256xi1> to vector<4x256xi1>
    %30 = vector.broadcast %cst : f32 to vector<4x256xf32>
    %31 = arith.select %29, %18, %30 : vector<4x256xi1>, vector<4x256xf32>
    %c255_i32 = arith.constant 255 : i32
    %32 = tpu.dynamic_rotate %0 by %c255_i32 dim 1 : vector<4x256xf32>, i32 -> vector<4x256xf32>
    %c1_i32_8 = arith.constant 1 : i32
    %33 = vector.broadcast %c1_i32_8 : i32 to vector<1x256xi32>
    %34 = arith.addi %17, %33 : vector<1x256xi32>
    %c0_i32_9 = arith.constant 0 : i32
    %35 = vector.broadcast %c0_i32_9 : i32 to vector<1x256xi32>
    %36 = arith.cmpi sge, %34, %35 : vector<1x256xi32>
    %c1_i32_10 = arith.constant 1 : i32
    %37 = vector.broadcast %c1_i32_10 : i32 to vector<1x256xi32>
    %38 = arith.addi %17, %37 : vector<1x256xi32>
    %c16_i32_11 = arith.constant 16 : i32
    %39 = vector.broadcast %c16_i32_11 : i32 to vector<1x256xi32>
    %40 = arith.cmpi slt, %38, %39 : vector<1x256xi32>
    %41 = arith.andi %36, %40 : vector<1x256xi1>
    %cst_12 = arith.constant 0.000000e+00 : f32
    %42 = vector.shape_cast %41 : vector<1x256xi1> to vector<1x256xi1>
    %43 = vector.broadcast %42 : vector<1x256xi1> to vector<4x256xi1>
    %44 = vector.broadcast %cst_12 : f32 to vector<4x256xf32>
    %45 = arith.select %43, %32, %44 : vector<4x256xi1>, vector<4x256xf32>
    %c2_i32 = arith.constant 2 : i32
    %46 = tpu.dynamic_rotate %0 by %c2_i32 dim 1 : vector<4x256xf32>, i32 -> vector<4x256xf32>
    %c-2_i32 = arith.constant -2 : i32
    %47 = vector.broadcast %c-2_i32 : i32 to vector<1x256xi32>
    %48 = arith.addi %17, %47 : vector<1x256xi32>
    %c0_i32_13 = arith.constant 0 : i32
    %49 = vector.broadcast %c0_i32_13 : i32 to vector<1x256xi32>
    %50 = arith.cmpi sge, %48, %49 : vector<1x256xi32>
    %c-2_i32_14 = arith.constant -2 : i32
    %51 = vector.broadcast %c-2_i32_14 : i32 to vector<1x256xi32>
    %52 = arith.addi %17, %51 : vector<1x256xi32>
    %c16_i32_15 = arith.constant 16 : i32
    %53 = vector.broadcast %c16_i32_15 : i32 to vector<1x256xi32>
    %54 = arith.cmpi slt, %52, %53 : vector<1x256xi32>
    %55 = arith.andi %50, %54 : vector<1x256xi1>
    %cst_16 = arith.constant 0.000000e+00 : f32
    %56 = vector.shape_cast %55 : vector<1x256xi1> to vector<1x256xi1>
    %57 = vector.broadcast %56 : vector<1x256xi1> to vector<4x256xi1>
    %58 = vector.broadcast %cst_16 : f32 to vector<4x256xf32>
    %59 = arith.select %57, %46, %58 : vector<4x256xi1>, vector<4x256xf32>
    %c254_i32 = arith.constant 254 : i32
    %60 = tpu.dynamic_rotate %0 by %c254_i32 dim 1 : vector<4x256xf32>, i32 -> vector<4x256xf32>
    %c2_i32_17 = arith.constant 2 : i32
    %61 = vector.broadcast %c2_i32_17 : i32 to vector<1x256xi32>
    %62 = arith.addi %17, %61 : vector<1x256xi32>
    %c0_i32_18 = arith.constant 0 : i32
    %63 = vector.broadcast %c0_i32_18 : i32 to vector<1x256xi32>
    %64 = arith.cmpi sge, %62, %63 : vector<1x256xi32>
    %c2_i32_19 = arith.constant 2 : i32
    %65 = vector.broadcast %c2_i32_19 : i32 to vector<1x256xi32>
    %66 = arith.addi %17, %65 : vector<1x256xi32>
    %c16_i32_20 = arith.constant 16 : i32
    %67 = vector.broadcast %c16_i32_20 : i32 to vector<1x256xi32>
    %68 = arith.cmpi slt, %66, %67 : vector<1x256xi32>
    %69 = arith.andi %64, %68 : vector<1x256xi1>
    %cst_21 = arith.constant 0.000000e+00 : f32
    %70 = vector.shape_cast %69 : vector<1x256xi1> to vector<1x256xi1>
    %71 = vector.broadcast %70 : vector<1x256xi1> to vector<4x256xi1>
    %72 = vector.broadcast %cst_21 : f32 to vector<4x256xf32>
    %73 = arith.select %71, %60, %72 : vector<4x256xi1>, vector<4x256xf32>
    %74 = tpu.concatenate %31, %0, %45, %59, %0, %73 in 0 : vector<4x256xf32>, vector<4x256xf32>, vector<4x256xf32>, vector<4x256xf32>, vector<4x256xf32>, vector<4x256xf32> -> vector<24x256xf32>
    %c0_22 = arith.constant 0 : index
    %c0_23 = arith.constant 0 : index
    %75 = vector.load %arg2[%c0_22, %c0_23] : memref<8x24xf32, #tpu.memory_space<vmem>>, vector<8x24xf32>
    %cst_24 = arith.constant dense<0.000000e+00> : vector<8x256xf32>
    %76 = tpu.matmul %75, %74, %cst_24 {dimension_numbers = #tpu.dot_dimension_numbers<[1], [0], [0], [1], [0, 0, 1, 1], [], []>} : vector<8x24xf32>, vector<24x256xf32>, vector<8x256xf32> -> vector<8x256xf32>
    %c0_25 = arith.constant 0 : index
    %c0_26 = arith.constant 0 : index
    %77 = vector.load %arg3[%c0_25, %c0_26] : memref<8x1xf32, #tpu.memory_space<vmem>>, vector<8x1xf32>
    %78 = vector.broadcast %77 : vector<8x1xf32> to vector<8x256xf32>
    %79 = arith.addf %76, %78 : vector<8x256xf32>
    %cst_27 = arith.constant 0.000000e+00 : f32
    %80 = vector.broadcast %cst_27 : f32 to vector<8x256xf32>
    %81 = arith.maximumf %79, %80 : vector<8x256xf32>
    %82 = tpu.concatenate %0, %81 in 0 : vector<4x256xf32>, vector<8x256xf32> -> vector<12x256xf32>
    %c0_28 = arith.constant 0 : index
    %c0_29 = arith.constant 0 : index
    %83 = vector.load %arg4[%c0_28, %c0_29] : memref<8x12xf32, #tpu.memory_space<vmem>>, vector<8x12xf32>
    %cst_30 = arith.constant dense<0.000000e+00> : vector<8x256xf32>
    %84 = tpu.matmul %83, %82, %cst_30 {dimension_numbers = #tpu.dot_dimension_numbers<[1], [0], [0], [1], [0, 0, 1, 1], [], []>} : vector<8x12xf32>, vector<12x256xf32>, vector<8x256xf32> -> vector<8x256xf32>
    %c0_31 = arith.constant 0 : index
    %c0_32 = arith.constant 0 : index
    %85 = vector.load %arg5[%c0_31, %c0_32] : memref<8x1xf32, #tpu.memory_space<vmem>>, vector<8x1xf32>
    %86 = vector.broadcast %85 : vector<8x1xf32> to vector<8x256xf32>
    %87 = arith.addf %84, %86 : vector<8x256xf32>
    %cst_33 = arith.constant 0.000000e+00 : f32
    %88 = vector.broadcast %cst_33 : f32 to vector<8x256xf32>
    %89 = arith.maximumf %87, %88 : vector<8x256xf32>
    %c0_34 = arith.constant 0 : index
    %c0_35 = arith.constant 0 : index
    %90 = vector.load %arg6[%c0_34, %c0_35] : memref<8x256xf32, #tpu.memory_space<vmem>>, vector<8x256xf32>
    tpu.vector_store %arg6[%c0_34, %c0_35], %89 {strides = array<i32>} : memref<8x256xf32, #tpu.memory_space<vmem>>, vector<8x256xf32>,
    return
  }
  func.func @transform_0(%arg0: i32) -> (i32, i32) {
    %c0_i32 = arith.constant 0 : i32
    %c0_i32_0 = arith.constant 0 : i32
    return %c0_i32, %arg0 : i32, i32
  }
  func.func @transform_1(%arg0: i32) -> (i32, i32) {
    %c0_i32 = arith.constant 0 : i32
    %c0_i32_0 = arith.constant 0 : i32
    %c0_i32_1 = arith.constant 0 : i32
    return %c0_i32, %c0_i32_0 : i32, i32
  }
  func.func @transform_2(%arg0: i32) -> (i32, i32) {
    %c0_i32 = arith.constant 0 : i32
    %c0_i32_0 = arith.constant 0 : i32
    %c0_i32_1 = arith.constant 0 : i32
    return %c0_i32, %c0_i32_0 : i32, i32
  }
  func.func @transform_3(%arg0: i32) -> (i32, i32) {
    %c0_i32 = arith.constant 0 : i32
    %c0_i32_0 = arith.constant 0 : i32
    %c0_i32_1 = arith.constant 0 : i32
    return %c0_i32, %c0_i32_0 : i32, i32
  }
  func.func @transform_4(%arg0: i32) -> (i32, i32) {
    %c0_i32 = arith.constant 0 : i32
    %c0_i32_0 = arith.constant 0 : i32
    %c0_i32_1 = arith.constant 0 : i32
    return %c0_i32, %c0_i32_0 : i32, i32
  }
  func.func @transform_5(%arg0: i32) -> (i32, i32) {
    %c0_i32 = arith.constant 0 : i32
    %c0_i32_0 = arith.constant 0 : i32
    return %c0_i32, %arg0 : i32, i32
  }
}

</mosaic_0001>

<bundles_post_ra>
// kernel: tpu_custom_call.1
= control target key start
LH: loop header
LB: loop body
LE: loop exit
PB: predicated region body
PF: predicated region fallthrough
CT: control target
= control target key end

     0   :  { %10 = vsyncpa [#allocation3], 0  ;;  %s1056_s0 = inlined_call_operand.vmem [shape: f32[4,512], index: 0, kind: input, shape index: {}]   ;;  %s1057_s1 = inlined_call_operand.hbm [shape: f32[8,24], index: 1, kind: input, shape index: {}]   ;;  %s1058_s2 = inlined_call_operand.vmem [shape: f32[8,1], index: 2, kind: input, shape index: {}]   ;;  %s1059_s3 = inlined_call_operand.hbm [shape: f32[8,12], index: 3, kind: input, shape index: {}]   ;;  %s1060_s4 = inlined_call_operand.vmem [shape: f32[8,1], index: 4, kind: input, shape index: {}]   ;;  %s1061_s5 = inlined_call_operand.hbm [shape: f32[8,512], index: 5, kind: output, shape index: {}]  }
   0x1   :  { %11 = vsyncpa [#allocation6], 0 }
   0x2   :  { %12 = vsyncpa [#allocation4], 0 }
   0x3   :  { %14 = vsyncpa [#allocation4 + $0x1], 0  ;;  %s921_s18 = smov 0   ;;  %s923_s19 = smov 0  }
   0x4   :  { %s925_s20 = smov 0   ;;  %s927_s21 = smov 0  }
   0x5 LB: > { %s942_s22 = sadd.s32 4294967295, %s882_s21   ;;  %s642_s23 = sadd.s32 4294967294, %s882_s21   ;;  %s882_s21 = sphi %s927_s21, %s1068_s21   ;;  %s878_s20 = sphi %s925_s20, %s1067_s20   ;;  %s874_s19 = sphi %s923_s19, %s1066_s19   ;;  %s870_s18 = sphi %s921_s18, %s1065_s18  }
   0x6   : > { %s946_s24 = sadd.s32 1, %s882_s21   ;;  %s137_s25 = sadd.s32 1, %s878_s20 }
   0x7   : > { %s134_s26 = ssub.s32 %s882_s21, %s946_s24  ;;  %p147_p0 = scmp.ne.s32.totalorder %s878_s20, %s874_s19 }
   0x8   : > { %p135_p1 = scmp.eq.s32.totalorder %s134_s26, 0  ;;  %p148_p2 = scmp.eq.s32.totalorder %s942_s22, 1 }
   0x9   : > { %p153_p3 = scmp.ne.s32.totalorder %s874_s19, %s870_s18  ;;  %p154_p4 = scmp.eq.s32.totalorder %s642_s23, 1 }
   0xa   : > { %s957_s27 = scalar_select %p135_p1, %s878_s20, %s137_s25  }
   0xb   : > { %p959_p5 = por %p148_p2, %p147_p0  ;;  %p963_p6 = por %p154_p4, %p153_p3 }
   0xc   : > { %p643_p7 = scmp.ge.s32.totalorder %s882_s21, 1  ;;  %p161_p8 = scmp.lt.s32.totalorder %s882_s21, 3 }
   0xd   : > { %p686_p9 = scmp.eq.s32.totalorder %s942_s22, 0  ;;  %s173_s8 = sshll.u32 %s1057_s1, 4  ;;  %s174_s8 = int_to_ptr.hbm [resolvable:$true] %s173_s8 }
   0xe   : > { %p970_p10 = pnand %p643_p7, %p161_p8  ;;  %s884_s9 = smov [#allocation2]  }
   0xf   : > { %s175_s10 = sshll.u32 %s884_s9, 4  ;;  %s188_s13 = sshll.u32 %s1059_s3, 4  ;;  %s176_s10 = int_to_ptr.vmem [resolvable:$true] %s175_s10  ;;  %s189_s13 = int_to_ptr.hbm [resolvable:$true] %s188_s13 }
  0x10   : > { %p675_p11 = pneg %p970_p10  ;;  %s885_s14 = smov [#allocation5]  }
  0x11   : > { %s190_s15 = sshll.u32 %s885_s14, 4  ;;  %215 = sbr.rel (%p970_p10) target bundleno = 474 (0x1da), region = 40  ;;  %s191_s15 = int_to_ptr.vmem [resolvable:$true] %s190_s15 }
  0x12   : > { %p676_p12 = pnand %p686_p9, %p675_p11 }
  0x14   : > { %678 = dma.hbm_to_vmem [thread:$0]  (!%p676_p12), %s174_s8, 128, %s176_s10, [#allocation3]  }
  0x15   : > { %681 = dma.hbm_to_vmem [thread:$0]  (!%p676_p12), %s189_s13, 128, %s191_s15, [#allocation6]  }
  0x16   : > { %857 = dma.done.wait (%p686_p9), [#allocation3], 128  }
  0x17   : > { %859 = vsyncadd (%p686_p9), [#allocation3], 4294967168 }
  0x18   : > { %861 = dma.done.wait (%p686_p9), [#allocation6], 128  }
  0x19   : > { %863 = vsyncadd (%p686_p9), [#allocation6], 4294967168  ;;  %s651_s16 = sshll.u32 %s942_s22, 1  ;;  %s886_s30 = smov 127   ;;  %v257_v17 = vlaneseq  ;;  %v420_v19 = vld [vmem:[%s1058_s2] sm:$0xff]  ;;  %v890_v20 = vmov 0  }
  0x1a   : > { %p250_p13 = scmp.lt.s32.totalorder %s651_s16, 3  ;;  %s887_s6 = smov 1   ;;  %750 = vset.pattern.permute.xlu2 %v890_v20  ;;  %751 = vset.pattern.permute.xlu0 %v890_v20  ;;  %v486_v25 = vld [vmem:[%s1060_s4] sm:$0xff]  ;;  %vm412_vm4 = vcmask 1043456   ;;  %vm426_vm13 = vcmask 195584   ;;  %vm492_vm14 = vcmask 97280  }
  0x1b   : > { %s888_s7 = smov 126   ;;  %s889_s8 = smov 2   ;;  %v258_v18 = vand.u32 127, %v257_v17  ;;  %423 = vperm.xlu2 %750, %v420_v19  }
  0x1c   : > { %s1070_s16 = smov (!%p250_p13, %s651_s16), 3  ;;  %s246_s13 = sand.u32 1, %s874_s19  }
  0x1d   : > { %s652_s17 = sshll.u32 %s1070_s16, 2  ;;  %v259_v21 = vadd.s32 128, %v258_v18  ;;  %v264_v23 = vand.u32 15, %v258_v18  ;;  %vm372_vm0 = vcmp.lt.s32.totalorder %v258_v18, 126  ;;  %vm346_vm3 = vcmp.lt.s32.totalorder %v258_v18, 2  ;;  %s650_s14 = sshll.u32 %s246_s13, 4 }
  0x1e   : > { %s253_s26 = scalar_lea.vmem %s1056_s0, %s652_s17  ;;  %vm320_vm5 = vcmp.lt.s32.totalorder %v258_v18, 127  ;;  %vm294_vm6 = vcmp.lt.s32.totalorder %v258_v18, 1  ;;  %s664_s15 = sshll.u32 %s942_s22, 4 }
  0x1f   : > { %v256_v0 = vld [vmem:[%s253_s26] sm:$0xff]  ;;  %v271_v24 = vand.u32 15, %v259_v21  ;;  %v375_v26 = vadd.s32 2, %v264_v23  ;;  %v349_v34 = vadd.s32 4294967294, %v264_v23  ;;  %v297_v38 = vadd.s32 4294967295, %v264_v23  ;;  %v485_v21 = vld [vmem:[#allocation5] sm:$0xff]  ;;  %s556_s23 = scalar_lea.hbm %s1061_s5, %s664_s15 }
  0x20   : > { %285 = vst [vmem:[#allocation1] ss:$2 sm:$0xff] %v256_v0  ;;  %v323_v44 = vadd.s32 1, %v264_v23  ;;  %s248_s25 = scalar_lea.vmem [#allocation7], %s650_s14  ;;  %s545_s22 = scalar_lea.sflag [#allocation4], %s246_s13 }
  0x21   : > { %v376_v27 = vadd.s32 2, %v271_v24  ;;  %vm379_vm1 = vcmp.lt.s32.totalorder %v375_v26, 16  ;;  %v350_v35 = vadd.s32 4294967294, %v271_v24  ;;  %v298_v39 = vadd.s32 4294967295, %v271_v24  ;;  %s558_s26 = sshll.u32 %s248_s25, 4  ;;  %s832_s10 = scalar_lea.hbm %s1061_s5, 32  ;;  %s559_s26 = int_to_ptr.vmem [resolvable:$true] %s558_s26 }
  0x22   : > { %v324_v45 = vadd.s32 1, %v271_v24  ;;  %vm351_vm7 = vcmp.ge.s32.totalorder %v349_v34, 0  ;;  %vm299_vm9 = vcmp.ge.s32.totalorder %v297_v38, 0  ;;  %vm327_vm11 = vcmp.lt.s32.totalorder %v323_v44, 16 }
  0x23   : > { %489 = vperm.xlu2 %750, %v486_v25   ;;  %vm380_vm2 = vcmp.lt.s32.totalorder %v376_v27, 16  ;;  %vm352_vm8 = vcmp.ge.s32.totalorder %v350_v35, 0  ;;  %vm300_vm10 = vcmp.ge.s32.totalorder %v298_v39, 0 }
  0x24   : > { %vm328_vm12 = vcmp.lt.s32.totalorder %v324_v45, 16 }
  0x27   : > { %v286_v1 = vld.sshfl [vmem:[#allocation1] sm:$0xff pattern:$0x75316420]  ;;  %v287_v2 = vld.sshfl [vmem:[#allocation1 + $0x8] sm:$0xff pattern:$0x75316420] }
  0x28   : > { %311 = vst [vmem:[#allocation1] ss:$2 sm:$0xff] %v256_v0  ;;  %v745_v6 = vpack.i.bf16 %v287_v2, %v286_v1 }
  0x2f   : > { %v312_v3 = vld.sshfl [vmem:[#allocation1] sm:$0xff pattern:$0x75316420]  ;;  %v313_v4 = vld.sshfl [vmem:[#allocation1 + $0x8] sm:$0xff pattern:$0x75316420] }
  0x30   : > { %337 = vst [vmem:[#allocation1] ss:$2 sm:$0xff] %v256_v0  ;;  %v740_v5 = vpack.i.bf16 %v313_v4, %v312_v3 }
  0x32   : > { %741 = vrot.lane.b32.xlu1 %v740_v5, %s886_s30  ;;  %s560_s30 = sshll.u32 %s556_s23, 4  ;;  %s561_s30 = int_to_ptr.hbm [resolvable:$true] %s560_s30 }
  0x37   : > { %v338_v7 = vld.sshfl [vmem:[#allocation1] sm:$0xff pattern:$0x75316420]  ;;  %v339_v8 = vld.sshfl [vmem:[#allocation1 + $0x8] sm:$0xff pattern:$0x75316420] }
  0x38   : > { %363 = vst [vmem:[#allocation1] ss:$2 sm:$0xff] %v256_v0  ;;  %v735_v12 = vpack.i.bf16 %v339_v8, %v338_v7  ;;  %v419_v7 = vld [vmem:[#allocation2] sm:$0xff] }
  0x3a   : > { %746 = vrot.lane.b32.xlu1 %v745_v6, %s887_s6  ;;  %s826_s6 = sshra.s32 %s561_s30, 4  ;;  %s827_s6 = int_to_ptr.hbm [resolvable:$true] %s826_s6 }
  0x3b   : > { %p833_p3 = scmp.lt.s32.totalorder %s827_s6, %s1061_s5 }
  0x3f   : > { %v364_v9 = vld.sshfl [vmem:[#allocation1] sm:$0xff pattern:$0x75316420]  ;;  %v365_v10 = vld.sshfl [vmem:[#allocation1 + $0x8] sm:$0xff pattern:$0x75316420] }
  0x40   : > { %v730_v11 = vpack.i.bf16 %v365_v10, %v364_v9  ;;  %390 = vst [vmem:[#allocation1 + $0x1] ss:$2 sm:$0xff] %v256_v0 }
  0x42   : > { %731 = vrot.lane.b32.xlu0 %v730_v11, %s888_s7  ;;  %s828_s7 = scalar_lea.hbm %s827_s6, 16 }
  0x43   : > { %p829_p0 = scmp.ne.s32.totalorder %s827_s6, %s828_s7  ;;  %p834_p4 = scmp.lt.s32.totalorder %s832_s10, %s828_s7 }
  0x45   : > { %p830_p1 = pnand %p829_p0, %p959_p5  ;;  %p835_p7 = por %p834_p4, %p833_p3 }
  0x47   : > { %v998_v13 = vld.sshfl [vmem:[#allocation1] sm:$0xff pattern:$0x75316420]  ;;  %v1000_v14 = vld.sshfl [vmem:[#allocation1 + $0x8] sm:$0xff pattern:$0x75316420]  ;;  %p831_p2 = pneg %p830_p1 }
  0x48   : > { %401 = vst [vmem:[#allocation1] ss:$2 sm:$0xff] %v256_v0 }
  0x49   : > { %p836_p8 = pnand %p835_p7, %p831_p2 }
  0x4a   : > { %736 = vrot.lane.b32.xlu0 %v735_v12, %s889_s8 }
  0x4f   : > { %v402_v15 = vld.sshfl [vmem:[#allocation1] sm:$0xff pattern:$0x75316420]  ;;  %v403_v16 = vld.sshfl [vmem:[#allocation1 + $0x8] sm:$0xff pattern:$0x75316420] }
  0x50   : > { %472 = vst [vmem:[#allocation1] ss:$2 sm:$0xff] %v256_v0 }
  0x57   : > { %v474_v17 = vld.sshfl [vmem:[#allocation1 + $0x8] sm:$0xff pattern:$0x75316420] }
  0x75   : > { %v424_v8 = vpop.permute.xlu2 %423 }
  0xa4   : > { %v742_v22 = vpop.permute.xlu1 %741 }
  0xa5   : > { %v744_v46 = vunpack.i.h.bf16 %v742_v22  ;;  %v743_v47 = vunpack.i.l.bf16 %v742_v22  ;;  %v490_v22 = vpop.permute.xlu2 %489 }
  0xa7   : > { %v321_v57 = vsel %vm320_vm5, %v743_v47, %v744_v46  ;;  %v322_v58 = vsel %vm320_vm5, %v744_v46, %v743_v47 }
  0xa8   : > { %v335_v1 = vsel %vm327_vm11, %v321_v57, 0.0  ;;  %v336_v2 = vsel %vm328_vm12, %v322_v58, 0.0 }
  0xac   : > { %v747_v31 = vpop.permute.xlu1 %746 }
  0xad   : > { %v749_v42 = vunpack.i.h.bf16 %v747_v31  ;;  %v748_v43 = vunpack.i.l.bf16 %v747_v31 }
  0xaf   : > { %v296_v53 = vsel %vm294_vm6, %v749_v42, %v748_v43  ;;  %v295_v54 = vsel %vm294_vm6, %v748_v43, %v749_v42 }
  0xb0   : > { %v309_v61 = vsel %vm299_vm9, %v296_v53, 0.0  ;;  %v310_v62 = vsel %vm300_vm10, %v295_v54, 0.0 }
  0xb1   : > { %v413_v5 = vsel %vm412_vm4, %v309_v61, %v998_v13  ;;  %v414_v6 = vsel %vm412_vm4, %v310_v62, %v1000_v14  ;;  %v473_v13 = vld.sshfl [vmem:[#allocation1] sm:$0xff pattern:$0x75316420] }
  0xb4   : > { %v732_v28 = vpop.permute.xlu0 %731 }
  0xb5   : > { %v734_v29 = vunpack.i.h.bf16 %v732_v28  ;;  %v733_v30 = vunpack.i.l.bf16 %v732_v28 }
  0xb7   : > { %v373_v32 = vsel %vm372_vm0, %v733_v30, %v734_v29  ;;  %v374_v33 = vsel %vm372_vm0, %v734_v29, %v733_v30 }
  0xb8   : > { %v387_v36 = vsel %vm379_vm1, %v373_v32, 0.0  ;;  %v388_v37 = vsel %vm380_vm2, %v374_v33, 0.0 }
  0xb9   : > { %v408_v40 = vrot.slane %v387_v36, 4  ;;  %v409_v41 = vrot.slane %v388_v37, 4 }
  0xbb   : > { %v417_v48 = vsel %vm412_vm4, %v402_v15, %v408_v40  ;;  %v418_v49 = vsel %vm412_vm4, %v403_v16, %v409_v41 }
  0xbc   : > { %v737_v50 = vpop.permute.xlu0 %736  ;;  %443 = vmatpush.msra.mxu0 %v417_v48  ;;  %463 = vmatpush.msra.mxu1 %v418_v49 }
  0xbd   : > { %v739_v51 = vunpack.i.h.bf16 %v737_v50  ;;  %v738_v52 = vunpack.i.l.bf16 %v737_v50 }
  0xbf   : > { %v347_v55 = vsel %vm346_vm3, %v738_v52, %v739_v51  ;;  %v348_v56 = vsel %vm346_vm3, %v739_v51, %v738_v52 }
  0xc0   : > { %v361_v59 = vsel %vm351_vm7, %v348_v56, 0.0  ;;  %v362_v60 = vsel %vm352_vm8, %v347_v55, 0.0 }
  0xc1   : > { %v397_v63 = vrot.slane %v361_v59, 4  ;;  %v398_v0 = vrot.slane %v362_v60, 4 }
  0xc3   : > { %v415_v3 = vsel %vm412_vm4, %v335_v1, %v397_v63  ;;  %v416_v4 = vsel %vm412_vm4, %v336_v2, %v398_v0 }
  0xc4   : > { %444 = vmatpush.msra.mxu0 %v415_v3  ;;  %464 = vmatpush.msra.mxu1 %v416_v4 }
  0xc6   : > { %445 = vmatpush.msra.mxu0 %v413_v5  ;;  %465 = vmatpush.msra.mxu1 %v414_v6 }
  0xc7   : > { %653 = vmatmul.msk.f32.vlgmr.msra.gmra.mxu0 %vm426_vm13, %v419_v7  ;;  %654 = vmatmul.msk.f32.vlgmr.msra.gmra.mxu1 %vm426_vm13, %v419_v7 }
 0x144   : > { %v447_v9 = vpop.f32.mrf.mxu0  ;;  %v467_v10 = vpop.f32.mrf.mxu1 }
 0x145   : > { %v448_v11 = vadd.f32 %v447_v9, %v424_v8  ;;  %v468_v12 = vadd.f32 %v467_v10, %v424_v8 }
 0x147   : > { %v470_v15 = vmax.f32 %v448_v11, 0.0  ;;  %v471_v16 = vmax.f32 %v468_v12, 0.0 }
 0x149   : > { %v479_v14 = vrot.slane %v470_v15, 4  ;;  %v480_v18 = vrot.slane %v471_v16, 4 }
 0x14b   : > { %655 = vmatpush.msk.msra.mxu2 %vm412_vm4, %v479_v14  ;;  %657 = vmatpush.msk.msra.mxu3 %vm412_vm4, %v480_v18  ;;  %v483_v19 = vsel %vm412_vm4, %v473_v13, %v479_v14  ;;  %v484_v20 = vsel %vm412_vm4, %v474_v17, %v480_v18 }
 0x14d   : > { %515 = vmatpush.msra.mxu2 %v483_v19  ;;  %535 = vmatpush.msra.mxu3 %v484_v20 }
 0x14e   : > { %656 = vmatmul.msk.f32.vlgmr.msra.gmra.mxu2 %vm492_vm14, %v485_v21  ;;  %658 = vmatmul.msk.f32.vlgmr.msra.gmra.mxu3 %vm492_vm14, %v485_v21 }
 0x1d1   : > { %v517_v23 = vpop.f32.mrf.mxu2  ;;  %v537_v24 = vpop.f32.mrf.mxu3 }
 0x1d2   : > { %v518_v25 = vadd.f32 %v517_v23, %v490_v22  ;;  %v538_v26 = vadd.f32 %v537_v24, %v490_v22 }
 0x1d4   : > { %v540_v27 = vmax.f32 %v518_v25, 0.0  ;;  %v541_v28 = vmax.f32 %v538_v26, 0.0 }
 0x1d6   : > { %542 = vst [vmem:[%s248_s25] sm:$0xff] %v540_v27 }
 0x1d7   : > { %543 = vst [vmem:[%s248_s25 + $0x8] sm:$0xff] %v541_v28 }
 0x1d8   : > { %839 = shalt.err (!%p836_p8)
}
 0x1d9   : > { %673 = dma.vmem_to_hbm [thread:$0]  (%p959_p5), %s559_s26, 256, %s561_s30, %s545_s22  }
 0x1da PF: > { %p690_p9 = scmp.ge.s32.totalorder %s882_s21, 2  ;;  %s572_s13 = sand.u32 1, %s870_s18  }
 0x1db   : > { %s573_s14 = scalar_lea.sflag [#allocation4], %s572_s13 }
 0x1dc   : > { %p683_p10 = pnand %p690_p9, %p963_p6 }
 0x1de   : > { %p684_p11 = pneg %p683_p10 }
 0x1e0   : > { %865 = dma.done.wait (%p684_p11), %s573_s14, 256  }
 0x1e1   : > { %867 = vsyncadd (%p684_p11), %s573_s14, 4294967040  ;;  %p17_p12 = scmp.ge.s32.totalorder %s946_s24, 4   ;;  %s1065_s18 = smov %s874_s19 }
 0x1e2   : > { %s1066_s19 = smov %s878_s20  ;;  %s1067_s20 = smov %s957_s27 }
 0x1e3   : > { %s1068_s21 = smov %s946_s24  ;;  %19 = sbr.rel (!%p17_p12) target bundleno = 5 (0x5), region = 85 }
 0x1e8   :  { %579 = vsyncpa [#allocation3], 1 }
 0x1e9   :  { %581 = vsyncpa [#allocation3 + $0x1], 1 }
 0x1ea   :  { %582 = vsyncpa [#allocation6], 1 }
 0x1eb   :  { %583 = vsyncpa [#allocation4], 1 }
 0x1ec   :  { %585 = vsyncpa [#allocation4 + $0x1], 1 }

</bundles_post_ra>
